<compile_context>
chip_gen: v5e
topology: v5e:2x2
jax: 0.10.0
libtpu: 0.0.40
codegen_flags: <defaults>
</compile_context>

<pallas_src>
import functools

import jax
import jax.numpy as jnp
from jax.experimental import pallas as pl
from jax.experimental.pallas import tpu as pltpu


def _round_up(x, m):
    return ((x + m - 1) // m) * m


def _vmem_cap_bytes():
    """Best-effort physical VMEM capacity (v7x: 64 MiB, v5e/v6e: 128 MiB)."""
    try:
        cap = getattr(pltpu.get_tpu_info(), "vmem_capacity_bytes", None)
        if cap:
            return int(cap)
    except Exception:
        pass
    return 64 * 1024 * 1024  # conservative fallback (v7x-sized)


def _matmul_kernel(*refs, apply_norm, valid_cols, c_pad, eps, tk, resident_rhs):
    """Produce one (tm, c_pad) output tile; grid axis 1 reduces over K.

    refs = (lhs, rhs[, bias, gamma, beta], out, acc_scratch)."""
    if apply_norm:
        lhs_ref, rhs_ref, bias_ref, gamma_ref, beta_ref, out_ref, acc_ref = refs
    else:
        lhs_ref, rhs_ref, out_ref, acc_ref = refs
        bias_ref = gamma_ref = beta_ref = None

    k = pl.program_id(1)

    @pl.when(k == 0)
    def _():
        acc_ref[...] = jnp.zeros_like(acc_ref)

    if resident_rhs:
        # rhs lives whole in VMEM; slice the current K chunk in place.
        off = pl.multiple_of(k * tk, tk)
        rhs = rhs_ref[pl.ds(off, tk), :]
    else:
        rhs = rhs_ref[...]

    # bf16 MXU operands, f32 accumulation in VMEM scratch.
    acc_ref[...] += jnp.dot(lhs_ref[...], rhs, preferred_element_type=jnp.float32)

    @pl.when(k == pl.num_programs(1) - 1)
    def _():
        x = acc_ref[...]
        if apply_norm:
            # bias add + LayerNorm over the first `valid_cols` channels.
            # Padded channels of x are exactly zero (zero weight/bias columns),
            # so the mean needs no mask.  f32 epilogue (v5e has no bf16 VPU/EUP).
            x = x + bias_ref[...]
            inv_c = 1.0 / valid_cols
            mean = jnp.sum(x, axis=-1, keepdims=True) * inv_c
            centered = x - mean
            if valid_cols != c_pad:
                col = jax.lax.broadcasted_iota(jnp.int32, x.shape, 1)
                centered = jnp.where(col < valid_cols, centered, 0.0)
            var = jnp.sum(centered * centered, axis=-1, keepdims=True) * inv_c
            x = centered * jax.lax.rsqrt(var + eps)
            x = x * gamma_ref[...] + beta_ref[...]
        out_ref[...] = x.astype(out_ref.dtype)


def _tiled_matmul(lhs, rhs, bias, gamma, beta, *, apply_norm, valid_cols,
                  tm, tk, out_dtype):
    """(M, K) @ (K, C_pad) -> (M, C_pad), row-parallel grid + K-reduction axis."""
    m, kdim = lhs.shape
    kr, c_pad = rhs.shape
    assert kr == kdim and m % tm == 0 and kdim % tk == 0, (lhs.shape, rhs.shape, tm, tk)
    grid = (m // tm, kdim // tk)

    itemsize = lambda a: jnp.dtype(a.dtype).itemsize
    rhs_full_bytes = kdim * c_pad * itemsize(rhs)
    lhs_tile_bytes = tm * tk * itemsize(lhs)
    out_tile_bytes = tm * c_pad * jnp.dtype(out_dtype).itemsize
    acc_bytes = tm * c_pad * 4
    param_bytes = (3 * 2 * c_pad * 4) if apply_norm else 0

    def footprint(rhs_resident_bytes):
        return (rhs_resident_bytes + 2 * lhs_tile_bytes + 2 * out_tile_bytes
                + acc_bytes + param_bytes)

    cap = _vmem_cap_bytes()
    # Keep the whole rhs resident in VMEM when it fits comfortably (the
    # constant index map still allocates two buffers); otherwise fall back
    # to streaming (tk, c_pad) rhs tiles.
    resident_rhs = footprint(2 * rhs_full_bytes) <= int(0.65 * cap)
    needed = footprint(2 * rhs_full_bytes if resident_rhs
                       else 2 * tk * c_pad * itemsize(rhs))
    vmem_limit = min(int(0.90 * cap),
                     max(32 * 1024 * 1024, int(needed * 1.3) + (2 << 20)))

    kernel = functools.partial(
        _matmul_kernel, apply_norm=apply_norm, valid_cols=valid_cols,
        c_pad=c_pad, eps=1e-5, tk=tk, resident_rhs=resident_rhs)

    if resident_rhs:
        rhs_spec = pl.BlockSpec((kdim, c_pad), lambda i, k: (0, 0))
    else:
        rhs_spec = pl.BlockSpec((tk, c_pad), lambda i, k: (k, 0))

    in_specs = [pl.BlockSpec((tm, tk), lambda i, k: (i, k)), rhs_spec]
    args = [lhs, rhs]
    if apply_norm:
        param_spec = pl.BlockSpec((1, c_pad), lambda i, k: (0, 0))
        in_specs += [param_spec, param_spec, param_spec]
        args += [bias, gamma, beta]

    rhs_traffic = rhs_full_bytes if resident_rhs else grid[0] * rhs_full_bytes
    cost = pl.CostEstimate(
        flops=2 * m * kdim * c_pad,
        transcendentals=m if apply_norm else 0,
        bytes_accessed=(m * kdim * itemsize(lhs) + rhs_traffic
                        + m * c_pad * jnp.dtype(out_dtype).itemsize),
    )

    return pl.pallas_call(
        kernel,
        out_shape=jax.ShapeDtypeStruct((m, c_pad), out_dtype),
        grid_spec=pltpu.PrefetchScalarGridSpec(
            num_scalar_prefetch=0,
            grid=grid,
            in_specs=in_specs,
            out_specs=pl.BlockSpec((tm, c_pad), lambda i, k: (i, 0)),
            scratch_shapes=[pltpu.VMEM((tm, c_pad), jnp.float32)],
        ),
        compiler_params=pltpu.CompilerParams(
            dimension_semantics=("parallel", "arbitrary"),
            vmem_limit_bytes=vmem_limit,
        ),
        cost_estimate=cost,
    )(*args)


def dense_ngcn_layer(adj_dense, features, weight, bias, gamma, beta, *,
                     iterations, max_tile=512):
    """DenseNGCNLayer.forward (eval mode) with tiled Pallas matmul kernels."""
    n, in_c = features.shape
    out_c = weight.shape[1]
    c_pad = max(128, pl.cdiv(out_c, 128) * 128)       # lane-dense channel axis

    # Node axis padded to a multiple of 128 (zero rows/cols contribute nothing
    # to valid rows and are sliced off at the end); tile = the largest
    # 128-multiple <= max_tile that divides the padded node count.
    n_pad = max(128, _round_up(n, 128))
    tile = next(t for t in range(min(max_tile, n_pad), 0, -128) if n_pad % t == 0)

    def pad2(a, rows, cols, dtype):
        return jnp.pad(a.astype(dtype),
                       ((0, rows - a.shape[0]), (0, cols - a.shape[1])))

    feat_p = pad2(features, n_pad, in_c, jnp.bfloat16)
    adj_p = pad2(adj_dense, n_pad, n_pad, jnp.bfloat16)   # bf16 halves adj DMA
    w_pad = pad2(weight, in_c, c_pad, jnp.bfloat16)
    bias_pad = pad2(bias, 1, c_pad, jnp.float32)
    gamma_pad = pad2(gamma, 1, c_pad, jnp.float32)
    beta_pad = pad2(beta, 1, c_pad, jnp.float32)

    # x = features @ W  (bias + LayerNorm fused here iff there is no propagation)
    x = _tiled_matmul(
        feat_p, w_pad, bias_pad, gamma_pad, beta_pad,
        apply_norm=(iterations == 1), valid_cols=out_c, tm=tile, tk=in_c,
        out_dtype=jnp.float32 if iterations == 1 else jnp.bfloat16)
    # TODO(synk): F.dropout in training mode (Bernoulli mask + 1/(1-p) scale via
    # pltpu.prng_*) is omitted; eval-mode dropout is the identity.

    # Propagation passes: x = A @ x; bias + LayerNorm fused into the final one.
    # Intermediate x stays bf16 (it is consumed as a bf16 MXU operand anyway).
    for it in range(iterations - 1):
        last = it == iterations - 2
        x = _tiled_matmul(
            adj_p, x, bias_pad, gamma_pad, beta_pad,
            apply_norm=last, valid_cols=out_c, tm=tile, tk=tile,
            out_dtype=jnp.float32 if last else jnp.bfloat16)
    return x[:n, :out_c]


def xavier_uniform(key, shape, dtype=jnp.float32):
    fan_in, fan_out = shape[0], shape[1]
    limit = (6.0 / (fan_in + fan_out)) ** 0.5
    return jax.random.uniform(key, shape, dtype, minval=-limit, maxval=limit)


def reference_forward(adj_dense, features, weight, bias, gamma, beta,
                      iterations):
    x = features @ weight
    for _ in range(iterations - 1):
        x = adj_dense @ x
    x = x + bias
    mean = jnp.mean(x, axis=-1, keepdims=True)
    var = jnp.mean((x - mean) ** 2, axis=-1, keepdims=True)
    return (x - mean) / jnp.sqrt(var + 1e-5) * gamma + beta


if __name__ == "__main__":
    # Small, module-consistent shapes (channel axis padded to 128 internally).
    N = 256            # number of graph nodes
    IN_CHANNELS = 64
    OUT_CHANNELS = 64
    ITERATIONS = 3
    DROPOUT_RATE = 0.5  # inert in eval mode

    key = jax.random.PRNGKey(0)
    k_w, k_b, k_feat, k_adj_mask, k_adj_val = jax.random.split(key, 5)

    # Deterministic parameter init (matches nn.init.xavier_uniform_ semantics).
    weight = xavier_uniform(k_w, (IN_CHANNELS, OUT_CHANNELS))
    bias = xavier_uniform(k_b, (1, OUT_CHANNELS))
    gamma = jnp.ones((1, OUT_CHANNELS), jnp.float32)   # LayerNorm weight init
    beta = jnp.zeros((1, OUT_CHANNELS), jnp.float32)   # LayerNorm bias init

    features = jax.random.normal(k_feat, (N, IN_CHANNELS), jnp.float32)

    # Synthetic sparse normalized adjacency, densified in glue JAX
    # (the module's spmm becomes a dense matmul inside the kernel).
    mask = jax.random.bernoulli(k_adj_mask, 0.05, (N, N))
    mask = jnp.logical_or(mask, jnp.eye(N, dtype=bool))          # self-loops
    vals = jax.random.uniform(k_adj_val, (N, N), jnp.float32, 0.1, 1.0)
    adj_dense = jnp.where(mask, vals, 0.0)
    deg = jnp.maximum(adj_dense.sum(axis=1), 1e-12)
    d_inv_sqrt = 1.0 / jnp.sqrt(deg)
    adj_dense = adj_dense * d_inv_sqrt[:, None] * d_inv_sqrt[None, :]

    out = dense_ngcn_layer(
        adj_dense, features, weight, bias, gamma, beta, iterations=ITERATIONS
    )
    out = jax.block_until_ready(out)

    ref = reference_forward(
        adj_dense, features, weight, bias, gamma, beta, ITERATIONS
    )
    assert out.shape == (N, OUT_CHANNELS)
    # bf16 MXU operands / bf16 intermediates (f32 accumulation) carry ~1e-2
    # relative error through the chained A @ x propagation before LayerNorm.
    assert jnp.allclose(out, ref, atol=5e-2, rtol=5e-2), float(
        jnp.max(jnp.abs(out - ref)))

    print("KERNEL_OK")
</pallas_src>

<mosaic_0001>
module attributes {stable_mosaic.version = 11 : i64} {
  func.func @_matmul_kernel(%arg0: i32, %arg1: i32, %arg2: memref<256x64xbf16, #tpu.memory_space<vmem>>, %arg3: memref<64x128xbf16, #tpu.memory_space<vmem>>, %arg4: memref<256x128xbf16, #tpu.memory_space<vmem>>, %arg5: memref<256x128xf32, #tpu.memory_space<vmem>>) attributes {dimension_semantics = [#tpu.dimension_semantics<parallel>, #tpu.dimension_semantics<arbitrary>], iteration_bounds = array<i64: 1, 1>, scalar_prefetch = 0 : i64, scratch_operands = 1 : i64, tpu.core_type = #tpu.core_type<tc>, window_params = [{transform_indices = @transform_0, window_bounds = array<i64: 256, 64>}, {pipeline_mode = #tpu.pipeline_mode<synchronous>, transform_indices = @transform_1, window_bounds = array<i64: 64, 128>}, {transform_indices = @transform_2, window_bounds = array<i64: 256, 128>}]} {
    %c0_i32 = arith.constant 0 : i32
    %0 = arith.cmpi eq, %arg1, %c0_i32 : i32
    %1 = arith.extui %0 : i1 to i32
    %c0_i32_0 = arith.constant 0 : i32
    %2 = arith.cmpi ne, %1, %c0_i32_0 : i32
    scf.if %2 {
      %cst_9 = arith.constant 0.000000e+00 : f32
      %15 = vector.broadcast %cst_9 : f32 to vector<256x128xf32>
      %c0_10 = arith.constant 0 : index
      %c0_11 = arith.constant 0 : index
      %16 = vector.load %arg5[%c0_10, %c0_11] : memref<256x128xf32, #tpu.memory_space<vmem>>, vector<256x128xf32>
      tpu.vector_store %arg5[%c0_10, %c0_11], %15 {strides = array<i32>} : memref<256x128xf32, #tpu.memory_space<vmem>>, vector<256x128xf32>,
    } else {
    }
    %c64_i32 = arith.constant 64 : i32
    %3 = arith.muli %arg1, %c64_i32 : i32
    %4 = tpu.assume_multiple %3, 64 : i32
    %5 = arith.index_cast %4 : i32 to index
    %c0 = arith.constant 0 : index
    %6 = vector.load %arg3[%5, %c0] : memref<64x128xbf16, #tpu.memory_space<vmem>>, vector<64x128xbf16>
    %c0_1 = arith.constant 0 : index
    %c0_2 = arith.constant 0 : index
    %7 = vector.load %arg5[%c0_1, %c0_2] : memref<256x128xf32, #tpu.memory_space<vmem>>, vector<256x128xf32>
    %c0_3 = arith.constant 0 : index
    %c0_4 = arith.constant 0 : index
    %8 = vector.load %arg2[%c0_3, %c0_4] : memref<256x64xbf16, #tpu.memory_space<vmem>>, vector<256x64xbf16>
    %cst = arith.constant dense<0.000000e+00> : vector<256x128xf32>
    %9 = tpu.matmul %8, %6, %cst {dimension_numbers = #tpu.dot_dimension_numbers<[1], [0], [0], [1], [0, 0, 1, 1], [], []>} : vector<256x64xbf16>, vector<64x128xbf16>, vector<256x128xf32> -> vector<256x128xf32>
    %10 = arith.addf %7, %9 : vector<256x128xf32>
    %c0_5 = arith.constant 0 : index
    %c0_6 = arith.constant 0 : index
    %11 = vector.load %arg5[%c0_5, %c0_6] : memref<256x128xf32, #tpu.memory_space<vmem>>, vector<256x128xf32>
    tpu.vector_store %arg5[%c0_5, %c0_6], %10 {strides = array<i32>} : memref<256x128xf32, #tpu.memory_space<vmem>>, vector<256x128xf32>,
    %c0_i32_7 = arith.constant 0 : i32
    %12 = arith.cmpi eq, %arg1, %c0_i32_7 : i32
    %13 = arith.extui %12 : i1 to i32
    %c0_i32_8 = arith.constant 0 : i32
    %14 = arith.cmpi ne, %13, %c0_i32_8 : i32
    scf.if %14 {
      %c0_9 = arith.constant 0 : index
      %c0_10 = arith.constant 0 : index
      %15 = vector.load %arg5[%c0_9, %c0_10] : memref<256x128xf32, #tpu.memory_space<vmem>>, vector<256x128xf32>
      %16 = arith.truncf %15 : vector<256x128xf32> to vector<256x128xbf16>
      %c0_11 = arith.constant 0 : index
      %c0_12 = arith.constant 0 : index
      %17 = vector.load %arg4[%c0_11, %c0_12] : memref<256x128xbf16, #tpu.memory_space<vmem>>, vector<256x128xbf16>
      tpu.vector_store %arg4[%c0_11, %c0_12], %16 {strides = array<i32>} : memref<256x128xbf16, #tpu.memory_space<vmem>>, vector<256x128xbf16>,
    } else {
    }
    return
  }
  func.func @transform_0(%arg0: i32, %arg1: i32) -> (i32, i32) {
    %c0_i32 = arith.constant 0 : i32
    return %arg0, %arg1 : i32, i32
  }
  func.func @transform_1(%arg0: i32, %arg1: i32) -> (i32, i32) {
    %c0_i32 = arith.constant 0 : i32
    %c0_i32_0 = arith.constant 0 : i32
    %c0_i32_1 = arith.constant 0 : i32
    return %c0_i32, %c0_i32_0 : i32, i32
  }
  func.func @transform_2(%arg0: i32, %arg1: i32) -> (i32, i32) {
    %c0_i32 = arith.constant 0 : i32
    %c0_i32_0 = arith.constant 0 : i32
    return %arg0, %c0_i32 : i32, i32
  }
}

</mosaic_0001>

<bundles_post_ra>
// kernel: tpu_custom_call.1
= control target key start
LH: loop header
LB: loop body
LE: loop exit
PB: predicated region body
PF: predicated region fallthrough
CT: control target
= control target key end

     0   :  { %s900_s0 = inlined_call_operand.vmem [shape: bf16[256,64], index: 0, kind: input, shape index: {}]   ;;  %s901_s1 = inlined_call_operand.vmem [shape: bf16[64,128], index: 1, kind: input, shape index: {}]   ;;  %s902_s2 = inlined_call_operand.hbm [shape: bf16[256,128], index: 2, kind: output, shape index: {}]  }
   0x1   :  { %v650_v0 = vld [vmem:[%s901_s1 + $0x18] sm:$0xff]  ;;  %v649_v1 = vld [vmem:[%s901_s1 + $0x10] sm:$0xff] }
   0x2   :  { %283 = vmatpush.bf16.msra.mxu0 %v650_v0  ;;  %762 = vmatpush.bf16.msra.mxu1 %v650_v0 }
   0x3   :  { %763 = vmatpush.bf16.msra.mxu2 %v650_v0  ;;  %764 = vmatpush.bf16.msra.mxu3 %v650_v0 }
   0x4   :  { %7 = vsyncpa [#allocation4], 0  ;;  %v648_v2 = vld [vmem:[%s901_s1 + $0x8] sm:$0xff]  ;;  %v647_v3 = vld [vmem:[%s901_s1] sm:$0xff]  ;;  %vm230_vm0 = vcmask 523264   ;;  %s537_s23 = sshll.u32 %s902_s2, 4  ;;  %s538_s23 = int_to_ptr.hbm [resolvable:$true] %s537_s23 }
   0x5   :  { %v651_v4 = vld [vmem:[%s900_s0] sm:$0xff]  ;;  %v652_v8 = vld [vmem:[%s900_s0 + $0x8] sm:$0xff]  ;;  %v653_v12 = vld [vmem:[%s900_s0 + $0x10] sm:$0xff]  ;;  %s804_s24 = smov 64   ;;  %s805_s1 = smov 4  }
   0x6   :  { %284 = vmatpush.bf16.msra.mxu0 %v649_v1  ;;  %765 = vmatpush.bf16.msra.mxu1 %v649_v1  ;;  %v655_v5 = vld [vmem:[%s900_s0 + $0x20] sm:$0xff]  ;;  %v656_v9 = vld [vmem:[%s900_s0 + $0x28] sm:$0xff]  ;;  %v657_v13 = vld [vmem:[%s900_s0 + $0x30] sm:$0xff] }
   0x7   :  { %766 = vmatpush.bf16.msra.mxu2 %v649_v1  ;;  %767 = vmatpush.bf16.msra.mxu3 %v649_v1  ;;  %v659_v6 = vld [vmem:[%s900_s0 + $0x40] sm:$0xff]  ;;  %v660_v10 = vld [vmem:[%s900_s0 + $0x48] sm:$0xff]  ;;  %v661_v14 = vld [vmem:[%s900_s0 + $0x50] sm:$0xff] }
   0x8   :  { %v663_v7 = vld [vmem:[%s900_s0 + $0x60] sm:$0xff]  ;;  %v664_v11 = vld [vmem:[%s900_s0 + $0x68] sm:$0xff]  ;;  %v665_v15 = vld [vmem:[%s900_s0 + $0x70] sm:$0xff] }
   0x9   :  { %v654_v16 = vld [vmem:[%s900_s0 + $0x18] sm:$0xff] }
   0xa   :  { %285 = vmatpush.bf16.msra.mxu0 %v648_v2  ;;  %768 = vmatpush.bf16.msra.mxu1 %v648_v2  ;;  %v658_v17 = vld [vmem:[%s900_s0 + $0x38] sm:$0xff] }
   0xb   :  { %769 = vmatpush.bf16.msra.mxu2 %v648_v2  ;;  %770 = vmatpush.bf16.msra.mxu3 %v648_v2  ;;  %v662_v18 = vld [vmem:[%s900_s0 + $0x58] sm:$0xff] }
   0xc   :  { %v666_v19 = vld [vmem:[%s900_s0 + $0x78] sm:$0xff]  ;;  %s803_s0 = smov [#allocation3]  }
   0xd   :  { %s535_s20 = sshll.u32 %s803_s0, 4  ;;  %s536_s20 = int_to_ptr.vmem [resolvable:$true] %s535_s20 }
   0xe   :  { %286 = vmatpush.bf16.msra.mxu0 %v647_v3  ;;  %771 = vmatpush.bf16.msra.mxu1 %v647_v3 }
   0xf   :  { %772 = vmatpush.bf16.msra.mxu2 %v647_v3  ;;  %773 = vmatpush.bf16.msra.mxu3 %v647_v3 }
  0x11   :  { %631 = vmatmul.msk.bf16.vlgmr.msra.gmra.mxu0 %vm230_vm0, %v651_v4  ;;  %635 = vmatmul.msk.bf16.vlgmr.msra.gmra.mxu1 %vm230_vm0, %v655_v5 }
  0x12   :  { %639 = vmatmul.msk.bf16.vlgmr.msra.gmra.mxu2 %vm230_vm0, %v659_v6  ;;  %643 = vmatmul.msk.bf16.vlgmr.msra.gmra.mxu3 %vm230_vm0, %v663_v7 }
  0x21   :  { %632 = vmatmul.msk.bf16.gmra.mxu0 %vm230_vm0, %v652_v8  ;;  %636 = vmatmul.msk.bf16.gmra.mxu1 %vm230_vm0, %v656_v9 }
  0x22   :  { %640 = vmatmul.msk.bf16.gmra.mxu2 %vm230_vm0, %v660_v10  ;;  %644 = vmatmul.msk.bf16.gmra.mxu3 %vm230_vm0, %v664_v11 }
  0x31   :  { %633 = vmatmul.msk.bf16.gmra.mxu0 %vm230_vm0, %v653_v12  ;;  %637 = vmatmul.msk.bf16.gmra.mxu1 %vm230_vm0, %v657_v13 }
  0x32   :  { %641 = vmatmul.msk.bf16.gmra.mxu2 %vm230_vm0, %v661_v14  ;;  %645 = vmatmul.msk.bf16.gmra.mxu3 %vm230_vm0, %v665_v15 }
  0x41   :  { %634 = vmatmul.msk.bf16.gmra.mxu0 %vm230_vm0, %v654_v16  ;;  %638 = vmatmul.msk.bf16.gmra.mxu1 %vm230_vm0, %v658_v17 }
  0x42   :  { %642 = vmatmul.msk.bf16.gmra.mxu2 %vm230_vm0, %v662_v18  ;;  %646 = vmatmul.msk.bf16.gmra.mxu3 %vm230_vm0, %v666_v19 }
  0x8e   :  { %v288_v20 = vpop.f32.mrf.mxu0  ;;  %v308_v21 = vpop.f32.mrf.mxu1 }
  0x95   :  { %v328_v22 = vpop.f32.mrf.mxu2  ;;  %v348_v23 = vpop.f32.mrf.mxu3 }
  0x96   :  { %v290_v24 = vpop.f32.mrf.mxu0  ;;  %v310_v25 = vpop.f32.mrf.mxu1 }
  0x97   :  { %v670_v26 = vpack.c.bf16 %v290_v24, %v288_v20  ;;  %v690_v27 = vpack.c.bf16 %v310_v25, %v308_v21 }
  0x99   :  { %671 = vst [vmem:[#allocation3] sm:$0xff] %v670_v26  }
  0x9a   :  { %750 = vst [vmem:[#allocation3 + $0x20] sm:$0xff] %v690_v27  }
  0x9d   :  { %v330_v28 = vpop.f32.mrf.mxu2  ;;  %v350_v29 = vpop.f32.mrf.mxu3 }
  0x9e   :  { %v710_v30 = vpack.c.bf16 %v330_v28, %v328_v22  ;;  %v730_v31 = vpack.c.bf16 %v350_v29, %v348_v23  ;;  %v293_v32 = vpop.f32.mrf.mxu0  ;;  %v313_v33 = vpop.f32.mrf.mxu1 }
  0xa0   :  { %754 = vst [vmem:[#allocation3 + $0x40] sm:$0xff] %v710_v30  }
  0xa1   :  { %758 = vst [vmem:[#allocation3 + $0x60] sm:$0xff] %v730_v31  }
  0xa5   :  { %v333_v34 = vpop.f32.mrf.mxu2  ;;  %v353_v35 = vpop.f32.mrf.mxu3 }
  0xa6   :  { %v295_v36 = vpop.f32.mrf.mxu0  ;;  %v315_v37 = vpop.f32.mrf.mxu1 }
  0xa7   :  { %v675_v38 = vpack.c.bf16 %v295_v36, %v293_v32  ;;  %v695_v39 = vpack.c.bf16 %v315_v37, %v313_v33 }
  0xa9   :  { %747 = vst [vmem:[#allocation3 + $0x8] sm:$0xff] %v675_v38  }
  0xaa   :  { %751 = vst [vmem:[#allocation3 + $0x28] sm:$0xff] %v695_v39  }
  0xad   :  { %v335_v40 = vpop.f32.mrf.mxu2  ;;  %v355_v41 = vpop.f32.mrf.mxu3 }
  0xae   :  { %v715_v42 = vpack.c.bf16 %v335_v40, %v333_v34  ;;  %v735_v43 = vpack.c.bf16 %v355_v41, %v353_v35  ;;  %v298_v44 = vpop.f32.mrf.mxu0  ;;  %v318_v45 = vpop.f32.mrf.mxu1 }
  0xb0   :  { %755 = vst [vmem:[#allocation3 + $0x48] sm:$0xff] %v715_v42  }
  0xb1   :  { %759 = vst [vmem:[#allocation3 + $0x68] sm:$0xff] %v735_v43  }
  0xb5   :  { %v338_v46 = vpop.f32.mrf.mxu2  ;;  %v358_v47 = vpop.f32.mrf.mxu3 }
  0xb6   :  { %v300_v48 = vpop.f32.mrf.mxu0  ;;  %v320_v49 = vpop.f32.mrf.mxu1 }
  0xb7   :  { %v680_v50 = vpack.c.bf16 %v300_v48, %v298_v44  ;;  %v700_v51 = vpack.c.bf16 %v320_v49, %v318_v45 }
  0xb9   :  { %748 = vst [vmem:[#allocation3 + $0x10] sm:$0xff] %v680_v50  }
  0xba   :  { %752 = vst [vmem:[#allocation3 + $0x30] sm:$0xff] %v700_v51  }
  0xbd   :  { %v340_v52 = vpop.f32.mrf.mxu2  ;;  %v360_v53 = vpop.f32.mrf.mxu3 }
  0xbe   :  { %v720_v54 = vpack.c.bf16 %v340_v52, %v338_v46  ;;  %v740_v55 = vpack.c.bf16 %v360_v53, %v358_v47  ;;  %v303_v56 = vpop.f32.mrf.mxu0  ;;  %v323_v57 = vpop.f32.mrf.mxu1 }
  0xc0   :  { %756 = vst [vmem:[#allocation3 + $0x50] sm:$0xff] %v720_v54  }
  0xc1   :  { %760 = vst [vmem:[#allocation3 + $0x70] sm:$0xff] %v740_v55  }
  0xc5   :  { %v343_v58 = vpop.f32.mrf.mxu2  ;;  %v363_v59 = vpop.f32.mrf.mxu3 }
  0xc6   :  { %v305_v60 = vpop.f32.mrf.mxu0  ;;  %v325_v61 = vpop.f32.mrf.mxu1 }
  0xc7   :  { %v685_v62 = vpack.c.bf16 %v305_v60, %v303_v56  ;;  %v705_v63 = vpack.c.bf16 %v325_v61, %v323_v57 }
  0xc9   :  { %749 = vst [vmem:[#allocation3 + $0x18] sm:$0xff] %v685_v62  }
  0xca   :  { %753 = vst [vmem:[#allocation3 + $0x38] sm:$0xff] %v705_v63  }
  0xcd   :  { %v345_v0 = vpop.f32.mrf.mxu2  ;;  %v365_v1 = vpop.f32.mrf.mxu3 }
  0xce   :  { %v725_v2 = vpack.c.bf16 %v345_v0, %v343_v58  ;;  %v745_v3 = vpack.c.bf16 %v365_v1, %v363_v59 }
  0xd0   :  { %757 = vst [vmem:[#allocation3 + $0x58] sm:$0xff] %v725_v2  }
  0xd1   :  { %761 = vst [vmem:[#allocation3 + $0x78] sm:$0xff] %v745_v3  }
  0xd2   :  { %543 = dma.vmem_to_hbm [thread:$0]  %s536_s20, 2048, %s538_s23, [#allocation4], %s804_s24, %s804_s24, %s805_s1  }
  0xd3   :  { %801 = dma.done.wait [#allocation4], 2048  }
  0xd4   :  { %802 = vsyncadd [#allocation4], 4294965248 }
  0xd5   :  { %548 = vsyncpa [#allocation4], 1 }

</bundles_post_ra>
